<compile_context>
chip_gen: v6e
topology: v6e:2x2x1
jax: 0.10.0
libtpu: 0.0.40
codegen_flags: <defaults>
</compile_context>

<pallas_src>
import functools

import jax
import jax.numpy as jnp
from jax import lax
from jax.experimental import pallas as pl
from jax.experimental.pallas import tpu as pltpu

_LANE = 128
_SUBLANE = 16          # bf16 sublane packing: batch tiles aligned to 16 rows
_UNROLL_DEPTH = 4      # unroll hidden-layer loop up to this static depth


def _round_up(n, m):
    return ((n + m - 1) // m) * m


def _pad_to(a, shape):
    pads = tuple((0, t - s) for s, t in zip(a.shape, shape))
    if all(p == (0, 0) for p in pads):
        return a
    return jnp.pad(a, pads)


def _vmem_cap_bytes():
    """Per-core VMEM capacity; conservative 64 MiB fallback (v7x per-TC)."""
    try:
        cap = int(pltpu.get_tpu_info().vmem_capacity_bytes)
        if cap > 0:
            return cap
    except Exception:
        pass
    return 64 << 20


def _mlp_resident_kernel(x_ref, w_in_ref, b_in_ref, w_h_ref, b_h_ref,
                         w_out_ref, b_out_ref, y_ref, *, hidden_depth):
    """All weights resident in VMEM. bf16 matmuls, f32 accumulation."""
    h = jnp.dot(x_ref[...], w_in_ref[...],
                preferred_element_type=jnp.float32)
    h = jnp.maximum(h + b_in_ref[...], 0.0).astype(jnp.bfloat16)

    if hidden_depth <= _UNROLL_DEPTH:
        # Small static depth: fully unrolled layer chain.
        for d in range(hidden_depth):
            a = jnp.dot(h, w_h_ref[d], preferred_element_type=jnp.float32)
            h = jnp.maximum(a + b_h_ref[d], 0.0).astype(jnp.bfloat16)
    else:
        # Deep stack: fori_loop bounds live ranges to one layer.
        def body(d, h):
            a = jnp.dot(h, w_h_ref[d], preferred_element_type=jnp.float32)
            return jnp.maximum(a + b_h_ref[d], 0.0).astype(jnp.bfloat16)
        h = lax.fori_loop(0, hidden_depth, body, h)

    y = jnp.dot(h, w_out_ref[...],
                preferred_element_type=jnp.float32) + b_out_ref[...]
    y_ref[...] = y.astype(y_ref.dtype)


def _mlp_stream_kernel(x_ref, w_in_ref, b_in_ref, w_h_hbm, b_h_ref,
                       w_out_ref, b_out_ref, y_ref, w_buf, sem,
                       *, hidden_depth):
    """Hidden weights stay in HBM; streamed one layer at a time via a 2-slot
    VMEM double buffer, DMA for layer d+1 overlapping layer d's matmul."""
    if hidden_depth > 0:
        # Prime: fetch layer 0 while the input layer's matmul runs.
        pltpu.make_async_copy(w_h_hbm.at[0], w_buf.at[0], sem.at[0]).start()

    h = jnp.dot(x_ref[...], w_in_ref[...],
                preferred_element_type=jnp.float32)
    h = jnp.maximum(h + b_in_ref[...], 0.0).astype(jnp.bfloat16)

    if hidden_depth > 0:
        def body(d, h):
            slot = d % 2
            pltpu.make_async_copy(w_h_hbm.at[d], w_buf.at[slot],
                                  sem.at[slot]).wait()

            @pl.when(d + 1 < hidden_depth)
            def _():
                pltpu.make_async_copy(w_h_hbm.at[d + 1], w_buf.at[1 - slot],
                                      sem.at[1 - slot]).start()

            a = jnp.dot(h, w_buf[slot], preferred_element_type=jnp.float32)
            return jnp.maximum(a + b_h_ref[d], 0.0).astype(jnp.bfloat16)

        h = lax.fori_loop(0, hidden_depth, body, h)

    y = jnp.dot(h, w_out_ref[...],
                preferred_element_type=jnp.float32) + b_out_ref[...]
    y_ref[...] = y.astype(y_ref.dtype)


def dnn_classifier_forward(x, params, *, input_dim, hidden_depth,
                           block_m=512, stream_hidden=None,
                           out_dtype=jnp.float32):
    """JAX/Pallas equivalent of DNNClassifier.forward (eval semantics)."""
    w_in, b_in, w_h, b_h, w_out, b_out = params

    # x.view(-1, input_dim)
    x2d = x.reshape(-1, input_dim)
    B = x2d.shape[0]
    H = w_in.shape[1]
    D_out = w_out.shape[1]

    # Lane-pad every feature dim to a multiple of 128 so stores are dense vst.
    d_in_p = _round_up(input_dim, _LANE)
    h_p = _round_up(H, _LANE)
    d_out_p = _round_up(D_out, _LANE)
    depth_pad = max(hidden_depth, 1)   # keep a non-empty leading dim

    # Batch tile selection:
    #  * tiny batches: clamp to round_up(B, 16) so zero rows aren't computed.
    #  * large batches: keep >= 2 grid steps so both v7x TensorCores get work.
    b_16 = _round_up(max(B, 1), _SUBLANE)
    block_m = max(_SUBLANE, min(block_m, b_16))
    if b_16 >= 2 * _LANE and (b_16 + block_m - 1) // block_m < 2:
        block_m = _round_up((b_16 + 1) // 2, _SUBLANE)
    b_p = _round_up(max(B, 1), block_m)
    grid = (b_p // block_m,)

    # Pad + cast operands (bf16 matmul operands, f32 biases).
    x_p = _pad_to(x2d, (b_p, d_in_p)).astype(jnp.bfloat16)
    w_in_p = _pad_to(w_in, (d_in_p, h_p)).astype(jnp.bfloat16)
    b_in_p = _pad_to(b_in, (1, h_p)).astype(jnp.float32)
    w_h_p = _pad_to(w_h, (depth_pad, h_p, h_p)).astype(jnp.bfloat16)
    b_h_p = _pad_to(b_h, (depth_pad, 1, h_p)).astype(jnp.float32)
    w_out_p = _pad_to(w_out, (h_p, d_out_p)).astype(jnp.bfloat16)
    b_out_p = _pad_to(b_out, (1, d_out_p)).astype(jnp.float32)

    # ---- VMEM budget (per TensorCore) ----------------------------------
    cap = _vmem_cap_bytes()
    bytes_wh = depth_pad * h_p * h_p * 2
    bytes_small = ((d_in_p * h_p + h_p * d_out_p) * 2
                   + (h_p + depth_pad * h_p + d_out_p) * 4)
    x_tile = 2 * block_m * d_in_p * 2            # double-buffered bf16 input
    y_tile = 2 * block_m * d_out_p * 4           # double-buffered output
    # Per-layer live set: f32 pre-activation + bf16 downcast + bf16 previous
    # activation (12 B/elem) plus the MXU accumulator / epilogue tile.
    layer_scratch = block_m * h_p * 12 + block_m * max(h_p, d_out_p) * 4
    headroom = 8 << 20

    resident_need = bytes_small + bytes_wh + x_tile + y_tile + layer_scratch
    if stream_hidden is None:
        # Stream hidden weights from HBM only when they would not fit resident
        # (v7x: 64 MiB/TC; v5e/v6e: 128 MiB).
        stream_hidden = (resident_need + headroom) > cap

    # Rough scheduling hint for XLA around the custom call.
    n_steps = grid[0]
    flops = 2 * b_p * (d_in_p * h_p + hidden_depth * h_p * h_p
                       + h_p * d_out_p)
    wh_traffic = bytes_wh * (n_steps if stream_hidden else 1)
    bytes_accessed = (x_p.size * 2 + w_in_p.size * 2 + w_out_p.size * 2
                      + wh_traffic + b_in_p.size * 4 + b_h_p.size * 4
                      + b_out_p.size * 4 + b_p * d_out_p * 4)
    cost = pl.CostEstimate(flops=flops, transcendentals=0,
                           bytes_accessed=int(bytes_accessed))

    def _build(single_buffer_params):
        # Constant-index parameter blocks do not need double-buffering.
        pkw = ({"pipeline_mode": pl.Buffered(1)}
               if single_buffer_params else {})
        pmult = 1 if single_buffer_params else 2

        x_spec = pl.BlockSpec((block_m, d_in_p), lambda i: (i, 0))
        w_in_spec = pl.BlockSpec((d_in_p, h_p), lambda i: (0, 0), **pkw)
        b_in_spec = pl.BlockSpec((1, h_p), lambda i: (0, 0), **pkw)
        b_h_spec = pl.BlockSpec((depth_pad, 1, h_p),
                                lambda i: (0, 0, 0), **pkw)
        w_out_spec = pl.BlockSpec((h_p, d_out_p), lambda i: (0, 0), **pkw)
        b_out_spec = pl.BlockSpec((1, d_out_p), lambda i: (0, 0), **pkw)
        out_spec = pl.BlockSpec((block_m, d_out_p), lambda i: (i, 0))

        if stream_hidden:
            kernel = functools.partial(_mlp_stream_kernel,
                                       hidden_depth=hidden_depth)
            w_h_spec = pl.BlockSpec(memory_space=pl.ANY)   # stays in HBM
            scratch = [pltpu.VMEM((2, h_p, h_p), jnp.bfloat16),
                       pltpu.SemaphoreType.DMA((2,))]
            wh_vmem = 2 * h_p * h_p * 2
        else:
            kernel = functools.partial(_mlp_resident_kernel,
                                       hidden_depth=hidden_depth)
            w_h_spec = pl.BlockSpec((depth_pad, h_p, h_p),
                                    lambda i: (0, 0, 0), **pkw)
            scratch = []
            wh_vmem = pmult * bytes_wh

        vmem_need = (pmult * bytes_small + wh_vmem + x_tile + y_tile
                     + layer_scratch + (4 << 20))
        usable_cap = max(cap - (4 << 20), 16 << 20)
        vmem_limit = int(min(max(vmem_need, 16 << 20), usable_cap))

        return pl.pallas_call(
            kernel,
            out_shape=jax.ShapeDtypeStruct((b_p, d_out_p), out_dtype),
            grid_spec=pltpu.PrefetchScalarGridSpec(
                num_scalar_prefetch=0,
                grid=grid,
                in_specs=[x_spec, w_in_spec, b_in_spec, w_h_spec, b_h_spec,
                          w_out_spec, b_out_spec],
                out_specs=out_spec,
                scratch_shapes=scratch),
            compiler_params=pltpu.CompilerParams(
                dimension_semantics=("parallel",),
                vmem_limit_bytes=vmem_limit),
            cost_estimate=cost,
        )

    args = (x_p, w_in_p, b_in_p, w_h_p, b_h_p, w_out_p, b_out_p)
    try:
        y_p = jax.block_until_ready(_build(True)(*args))
    except Exception:
        # Fallback for Pallas versions that reject single-buffered
        # (Buffered(1)) parameter BlockSpecs: default double-buffering.
        y_p = _build(False)(*args)

    # Strip batch + lane padding.
    return y_p[:B, :D_out]


def init_params(key, input_dim, hidden_dim, output_dim, hidden_depth):
    """Deterministic synthetic parameters (nn.Linear shapes, stored
    transposed as (in, out))."""
    ks = jax.random.split(key, 6)
    scale_in = 1.0 / jnp.sqrt(input_dim)
    scale_h = 1.0 / jnp.sqrt(hidden_dim)
    w_in = jax.random.uniform(ks[0], (input_dim, hidden_dim),
                              jnp.float32, -scale_in, scale_in)
    b_in = jax.random.uniform(ks[1], (1, hidden_dim),
                              jnp.float32, -scale_in, scale_in)
    w_h = jax.random.uniform(ks[2], (hidden_depth, hidden_dim, hidden_dim),
                             jnp.float32, -scale_h, scale_h)
    b_h = jax.random.uniform(ks[3], (hidden_depth, 1, hidden_dim),
                             jnp.float32, -scale_h, scale_h)
    w_out = jax.random.uniform(ks[4], (hidden_dim, output_dim),
                               jnp.float32, -scale_h, scale_h)
    b_out = jax.random.uniform(ks[5], (1, output_dim),
                               jnp.float32, -scale_h, scale_h)
    return (w_in, b_in, w_h, b_h, w_out, b_out)


def reference_forward(x, params, input_dim, hidden_depth):
    """Pure-JAX reference mirroring the kernel numerics
    (bf16 operands, f32 accumulation)."""
    w_in, b_in, w_h, b_h, w_out, b_out = params
    h = x.reshape(-1, input_dim).astype(jnp.bfloat16)
    h = jnp.dot(h, w_in.astype(jnp.bfloat16),
                preferred_element_type=jnp.float32) + b_in
    h = jnp.maximum(h, 0.0).astype(jnp.bfloat16)
    for d in range(hidden_depth):
        a = jnp.dot(h, w_h[d].astype(jnp.bfloat16),
                    preferred_element_type=jnp.float32) + b_h[d]
        h = jnp.maximum(a, 0.0).astype(jnp.bfloat16)
    return jnp.dot(h, w_out.astype(jnp.bfloat16),
                   preferred_element_type=jnp.float32) + b_out


# TODO(synk): training-side members of DNNClassifier (Adam optimizer,
# get_loss/one_hot_embedding, the unused `sample` flag) are out of scope for
# this forward-pass kernel.

if __name__ == "__main__":
    # Small shapes consistent with the module's forward (x.view(-1, input_dim)).
    input_dim, hidden_dim, output_dim, hidden_depth = 16, 32, 8, 2

    key = jax.random.PRNGKey(0)
    k_x, k_p, k_p2 = jax.random.split(key, 3)
    # x is (2, 4, 16) -> view(-1, 16) gives a batch of 8 rows.
    x = jax.random.normal(k_x, (2, 4, input_dim), jnp.float32)
    params = init_params(k_p, input_dim, hidden_dim, output_dim, hidden_depth)
    y_ref = reference_forward(x, params, input_dim, hidden_depth)

    # 1) Default path: weights resident in VMEM, single-buffered params.
    y = dnn_classifier_forward(x, params, input_dim=input_dim,
                               hidden_depth=hidden_depth)
    y = jax.block_until_ready(y)
    assert y.shape == (8, output_dim)
    assert jnp.allclose(y, y_ref, atol=1e-2, rtol=1e-2), (
        float(jnp.max(jnp.abs(y - y_ref))))

    # 2) HBM-streamed hidden-weight path (the v7x big-model fallback),
    #    exercised here at small shape so it is validated too.
    y_s = dnn_classifier_forward(x, params, input_dim=input_dim,
                                 hidden_depth=hidden_depth,
                                 stream_hidden=True)
    y_s = jax.block_until_ready(y_s)
    assert jnp.allclose(y_s, y_ref, atol=1e-2, rtol=1e-2), (
        float(jnp.max(jnp.abs(y_s - y_ref))))

    # 3) Deeper stack exercising the fori_loop hidden-layer path.
    depth2 = 6
    params2 = init_params(k_p2, input_dim, hidden_dim, output_dim, depth2)
    y_d = dnn_classifier_forward(x, params2, input_dim=input_dim,
                                 hidden_depth=depth2)
    y_d = jax.block_until_ready(y_d)
    y_d_ref = reference_forward(x, params2, input_dim, depth2)
    assert jnp.allclose(y_d, y_d_ref, atol=1e-2, rtol=1e-2), (
        float(jnp.max(jnp.abs(y_d - y_d_ref))))

    print("KERNEL_OK")
</pallas_src>

<mosaic_0001>
module attributes {stable_mosaic.version = 11 : i64} {
  func.func @_mlp_resident_kernel(%arg0: i32, %arg1: memref<16x128xbf16, #tpu.memory_space<vmem>>, %arg2: memref<128x128xbf16, #tpu.memory_space<vmem>>, %arg3: memref<1x128xf32, #tpu.memory_space<vmem>>, %arg4: memref<2x128x128xbf16, #tpu.memory_space<vmem>>, %arg5: memref<2x1x128xf32, #tpu.memory_space<vmem>>, %arg6: memref<128x128xbf16, #tpu.memory_space<vmem>>, %arg7: memref<1x128xf32, #tpu.memory_space<vmem>>, %arg8: memref<16x128xf32, #tpu.memory_space<vmem>>) attributes {dimension_semantics = [#tpu.dimension_semantics<parallel>], iteration_bounds = array<i64: 1>, scalar_prefetch = 0 : i64, scratch_operands = 0 : i64, tpu.core_type = #tpu.core_type<tc>, window_params = [{transform_indices = @transform_0, window_bounds = array<i64: 16, 128>}, {pipeline_mode = #tpu.pipeline_mode<synchronous>, transform_indices = @transform_1, window_bounds = array<i64: 128, 128>}, {pipeline_mode = #tpu.pipeline_mode<synchronous>, transform_indices = @transform_2, window_bounds = array<i64: 1, 128>}, {pipeline_mode = #tpu.pipeline_mode<synchronous>, transform_indices = @transform_3, window_bounds = array<i64: 2, 128, 128>}, {pipeline_mode = #tpu.pipeline_mode<synchronous>, transform_indices = @transform_4, window_bounds = array<i64: 2, 1, 128>}, {pipeline_mode = #tpu.pipeline_mode<synchronous>, transform_indices = @transform_5, window_bounds = array<i64: 128, 128>}, {pipeline_mode = #tpu.pipeline_mode<synchronous>, transform_indices = @transform_6, window_bounds = array<i64: 1, 128>}, {transform_indices = @transform_7, window_bounds = array<i64: 16, 128>}]} {
    %c0 = arith.constant 0 : index
    %c0_0 = arith.constant 0 : index
    %0 = vector.load %arg1[%c0, %c0_0] : memref<16x128xbf16, #tpu.memory_space<vmem>>, vector<16x128xbf16>
    %c0_1 = arith.constant 0 : index
    %c0_2 = arith.constant 0 : index
    %1 = vector.load %arg2[%c0_1, %c0_2] : memref<128x128xbf16, #tpu.memory_space<vmem>>, vector<128x128xbf16>
    %cst = arith.constant dense<0.000000e+00> : vector<16x128xf32>
    %2 = tpu.matmul %0, %1, %cst {dimension_numbers = #tpu.dot_dimension_numbers<[1], [0], [0], [1], [0, 0, 1, 1], [], []>} : vector<16x128xbf16>, vector<128x128xbf16>, vector<16x128xf32> -> vector<16x128xf32>
    %c0_3 = arith.constant 0 : index
    %c0_4 = arith.constant 0 : index
    %3 = vector.load %arg3[%c0_3, %c0_4] : memref<1x128xf32, #tpu.memory_space<vmem>>, vector<1x128xf32>
    %4 = vector.broadcast %3 : vector<1x128xf32> to vector<16x128xf32>
    %5 = arith.addf %2, %4 : vector<16x128xf32>
    %cst_5 = arith.constant 0.000000e+00 : f32
    %6 = vector.broadcast %cst_5 : f32 to vector<16x128xf32>
    %7 = arith.maximumf %5, %6 : vector<16x128xf32>
    %8 = arith.truncf %7 : vector<16x128xf32> to vector<16x128xbf16>
    %c0_6 = arith.constant 0 : index
    %c0_7 = arith.constant 0 : index
    %c0_8 = arith.constant 0 : index
    %9 = vector.load %arg4[%c0_6, %c0_7, %c0_8] : memref<2x128x128xbf16, #tpu.memory_space<vmem>>, vector<1x128x128xbf16>
    %10 = vector.shape_cast %9 : vector<1x128x128xbf16> to vector<128x128xbf16>
    %cst_9 = arith.constant dense<0.000000e+00> : vector<16x128xf32>
    %11 = tpu.matmul %8, %10, %cst_9 {dimension_numbers = #tpu.dot_dimension_numbers<[1], [0], [0], [1], [0, 0, 1, 1], [], []>} : vector<16x128xbf16>, vector<128x128xbf16>, vector<16x128xf32> -> vector<16x128xf32>
    %c0_10 = arith.constant 0 : index
    %c0_11 = arith.constant 0 : index
    %c0_12 = arith.constant 0 : index
    %12 = vector.load %arg5[%c0_10, %c0_11, %c0_12] : memref<2x1x128xf32, #tpu.memory_space<vmem>>, vector<1x1x128xf32>
    %13 = vector.shape_cast %12 : vector<1x1x128xf32> to vector<1x128xf32>
    %14 = vector.broadcast %13 : vector<1x128xf32> to vector<16x128xf32>
    %15 = arith.addf %11, %14 : vector<16x128xf32>
    %cst_13 = arith.constant 0.000000e+00 : f32
    %16 = vector.broadcast %cst_13 : f32 to vector<16x128xf32>
    %17 = arith.maximumf %15, %16 : vector<16x128xf32>
    %18 = arith.truncf %17 : vector<16x128xf32> to vector<16x128xbf16>
    %c1 = arith.constant 1 : index
    %c0_14 = arith.constant 0 : index
    %c0_15 = arith.constant 0 : index
    %19 = vector.load %arg4[%c1, %c0_14, %c0_15] : memref<2x128x128xbf16, #tpu.memory_space<vmem>>, vector<1x128x128xbf16>
    %20 = vector.shape_cast %19 : vector<1x128x128xbf16> to vector<128x128xbf16>
    %cst_16 = arith.constant dense<0.000000e+00> : vector<16x128xf32>
    %21 = tpu.matmul %18, %20, %cst_16 {dimension_numbers = #tpu.dot_dimension_numbers<[1], [0], [0], [1], [0, 0, 1, 1], [], []>} : vector<16x128xbf16>, vector<128x128xbf16>, vector<16x128xf32> -> vector<16x128xf32>
    %c1_17 = arith.constant 1 : index
    %c0_18 = arith.constant 0 : index
    %c0_19 = arith.constant 0 : index
    %22 = vector.load %arg5[%c1_17, %c0_18, %c0_19] : memref<2x1x128xf32, #tpu.memory_space<vmem>>, vector<1x1x128xf32>
    %23 = vector.shape_cast %22 : vector<1x1x128xf32> to vector<1x128xf32>
    %24 = vector.broadcast %23 : vector<1x128xf32> to vector<16x128xf32>
    %25 = arith.addf %21, %24 : vector<16x128xf32>
    %cst_20 = arith.constant 0.000000e+00 : f32
    %26 = vector.broadcast %cst_20 : f32 to vector<16x128xf32>
    %27 = arith.maximumf %25, %26 : vector<16x128xf32>
    %28 = arith.truncf %27 : vector<16x128xf32> to vector<16x128xbf16>
    %c0_21 = arith.constant 0 : index
    %c0_22 = arith.constant 0 : index
    %29 = vector.load %arg6[%c0_21, %c0_22] : memref<128x128xbf16, #tpu.memory_space<vmem>>, vector<128x128xbf16>
    %cst_23 = arith.constant dense<0.000000e+00> : vector<16x128xf32>
    %30 = tpu.matmul %28, %29, %cst_23 {dimension_numbers = #tpu.dot_dimension_numbers<[1], [0], [0], [1], [0, 0, 1, 1], [], []>} : vector<16x128xbf16>, vector<128x128xbf16>, vector<16x128xf32> -> vector<16x128xf32>
    %c0_24 = arith.constant 0 : index
    %c0_25 = arith.constant 0 : index
    %31 = vector.load %arg7[%c0_24, %c0_25] : memref<1x128xf32, #tpu.memory_space<vmem>>, vector<1x128xf32>
    %32 = vector.broadcast %31 : vector<1x128xf32> to vector<16x128xf32>
    %33 = arith.addf %30, %32 : vector<16x128xf32>
    %c0_26 = arith.constant 0 : index
    %c0_27 = arith.constant 0 : index
    %34 = vector.load %arg8[%c0_26, %c0_27] : memref<16x128xf32, #tpu.memory_space<vmem>>, vector<16x128xf32>
    tpu.vector_store %arg8[%c0_26, %c0_27], %33 {strides = array<i32>} : memref<16x128xf32, #tpu.memory_space<vmem>>, vector<16x128xf32>,
    return
  }
  func.func @transform_0(%arg0: i32) -> (i32, i32) {
    %c0_i32 = arith.constant 0 : i32
    %c0_i32_0 = arith.constant 0 : i32
    return %arg0, %c0_i32 : i32, i32
  }
  func.func @transform_1(%arg0: i32) -> (i32, i32) {
    %c0_i32 = arith.constant 0 : i32
    %c0_i32_0 = arith.constant 0 : i32
    %c0_i32_1 = arith.constant 0 : i32
    return %c0_i32, %c0_i32_0 : i32, i32
  }
  func.func @transform_2(%arg0: i32) -> (i32, i32) {
    %c0_i32 = arith.constant 0 : i32
    %c0_i32_0 = arith.constant 0 : i32
    %c0_i32_1 = arith.constant 0 : i32
    return %c0_i32, %c0_i32_0 : i32, i32
  }
  func.func @transform_3(%arg0: i32) -> (i32, i32, i32) {
    %c0_i32 = arith.constant 0 : i32
    %c0_i32_0 = arith.constant 0 : i32
    %c0_i32_1 = arith.constant 0 : i32
    %c0_i32_2 = arith.constant 0 : i32
    return %c0_i32, %c0_i32_0, %c0_i32_1 : i32, i32, i32
  }
  func.func @transform_4(%arg0: i32) -> (i32, i32, i32) {
    %c0_i32 = arith.constant 0 : i32
    %c0_i32_0 = arith.constant 0 : i32
    %c0_i32_1 = arith.constant 0 : i32
    %c0_i32_2 = arith.constant 0 : i32
    return %c0_i32, %c0_i32_0, %c0_i32_1 : i32, i32, i32
  }
  func.func @transform_5(%arg0: i32) -> (i32, i32) {
    %c0_i32 = arith.constant 0 : i32
    %c0_i32_0 = arith.constant 0 : i32
    %c0_i32_1 = arith.constant 0 : i32
    return %c0_i32, %c0_i32_0 : i32, i32
  }
  func.func @transform_6(%arg0: i32) -> (i32, i32) {
    %c0_i32 = arith.constant 0 : i32
    %c0_i32_0 = arith.constant 0 : i32
    %c0_i32_1 = arith.constant 0 : i32
    return %c0_i32, %c0_i32_0 : i32, i32
  }
  func.func @transform_7(%arg0: i32) -> (i32, i32) {
    %c0_i32 = arith.constant 0 : i32
    %c0_i32_0 = arith.constant 0 : i32
    return %arg0, %c0_i32 : i32, i32
  }
}

module attributes {stable_mosaic.version = 11 : i64} {
  func.func @_mlp_resident_kernel(%arg0: i32, %arg1: memref<16x128xbf16, #tpu.memory_space<vmem>>, %arg2: memref<128x128xbf16, #tpu.memory_space<vmem>>, %arg3: memref<1x128xf32, #tpu.memory_space<vmem>>, %arg4: memref<2x128x128xbf16, #tpu.memory_space<vmem>>, %arg5: memref<2x1x128xf32, #tpu.memory_space<vmem>>, %arg6: memref<128x128xbf16, #tpu.memory_space<vmem>>, %arg7: memref<1x128xf32, #tpu.memory_space<vmem>>, %arg8: memref<16x128xf32, #tpu.memory_space<vmem>>) attributes {dimension_semantics = [#tpu.dimension_semantics<parallel>], iteration_bounds = array<i64: 1>, scalar_prefetch = 0 : i64, scratch_operands = 0 : i64, tpu.core_type = #tpu.core_type<tc>, window_params = [{transform_indices = @transform_0, window_bounds = array<i64: 16, 128>}, {pipeline_mode = #tpu.pipeline_mode<synchronous>, transform_indices = @transform_1, window_bounds = array<i64: 128, 128>}, {pipeline_mode = #tpu.pipeline_mode<synchronous>, transform_indices = @transform_2, window_bounds = array<i64: 1, 128>}, {pipeline_mode = #tpu.pipeline_mode<synchronous>, transform_indices = @transform_3, window_bounds = array<i64: 2, 128, 128>}, {pipeline_mode = #tpu.pipeline_mode<synchronous>, transform_indices = @transform_4, window_bounds = array<i64: 2, 1, 128>}, {pipeline_mode = #tpu.pipeline_mode<synchronous>, transform_indices = @transform_5, window_bounds = array<i64: 128, 128>}, {pipeline_mode = #tpu.pipeline_mode<synchronous>, transform_indices = @transform_6, window_bounds = array<i64: 1, 128>}, {transform_indices = @transform_7, window_bounds = array<i64: 16, 128>}]} {
    %c0 = arith.constant 0 : index
    %c0_0 = arith.constant 0 : index
    %0 = vector.load %arg1[%c0, %c0_0] : memref<16x128xbf16, #tpu.memory_space<vmem>>, vector<16x128xbf16>
    %c0_1 = arith.constant 0 : index
    %c0_2 = arith.constant 0 : index
    %1 = vector.load %arg2[%c0_1, %c0_2] : memref<128x128xbf16, #tpu.memory_space<vmem>>, vector<128x128xbf16>
    %cst = arith.constant dense<0.000000e+00> : vector<16x128xf32>
    %2 = tpu.matmul %0, %1, %cst {dimension_numbers = #tpu.dot_dimension_numbers<[1], [0], [0], [1], [0, 0, 1, 1], [], []>} : vector<16x128xbf16>, vector<128x128xbf16>, vector<16x128xf32> -> vector<16x128xf32>
    %c0_3 = arith.constant 0 : index
    %c0_4 = arith.constant 0 : index
    %3 = vector.load %arg3[%c0_3, %c0_4] : memref<1x128xf32, #tpu.memory_space<vmem>>, vector<1x128xf32>
    %4 = vector.broadcast %3 : vector<1x128xf32> to vector<16x128xf32>
    %5 = arith.addf %2, %4 : vector<16x128xf32>
    %cst_5 = arith.constant 0.000000e+00 : f32
    %6 = vector.broadcast %cst_5 : f32 to vector<16x128xf32>
    %7 = arith.maximumf %5, %6 : vector<16x128xf32>
    %8 = arith.truncf %7 : vector<16x128xf32> to vector<16x128xbf16>
    %c0_6 = arith.constant 0 : index
    %c0_7 = arith.constant 0 : index
    %c0_8 = arith.constant 0 : index
    %9 = vector.load %arg4[%c0_6, %c0_7, %c0_8] : memref<2x128x128xbf16, #tpu.memory_space<vmem>>, vector<1x128x128xbf16>
    %10 = vector.shape_cast %9 : vector<1x128x128xbf16> to vector<128x128xbf16>
    %cst_9 = arith.constant dense<0.000000e+00> : vector<16x128xf32>
    %11 = tpu.matmul %8, %10, %cst_9 {dimension_numbers = #tpu.dot_dimension_numbers<[1], [0], [0], [1], [0, 0, 1, 1], [], []>} : vector<16x128xbf16>, vector<128x128xbf16>, vector<16x128xf32> -> vector<16x128xf32>
    %c0_10 = arith.constant 0 : index
    %c0_11 = arith.constant 0 : index
    %c0_12 = arith.constant 0 : index
    %12 = vector.load %arg5[%c0_10, %c0_11, %c0_12] : memref<2x1x128xf32, #tpu.memory_space<vmem>>, vector<1x1x128xf32>
    %13 = vector.shape_cast %12 : vector<1x1x128xf32> to vector<1x128xf32>
    %14 = vector.broadcast %13 : vector<1x128xf32> to vector<16x128xf32>
    %15 = arith.addf %11, %14 : vector<16x128xf32>
    %cst_13 = arith.constant 0.000000e+00 : f32
    %16 = vector.broadcast %cst_13 : f32 to vector<16x128xf32>
    %17 = arith.maximumf %15, %16 : vector<16x128xf32>
    %18 = arith.truncf %17 : vector<16x128xf32> to vector<16x128xbf16>
    %c1 = arith.constant 1 : index
    %c0_14 = arith.constant 0 : index
    %c0_15 = arith.constant 0 : index
    %19 = vector.load %arg4[%c1, %c0_14, %c0_15] : memref<2x128x128xbf16, #tpu.memory_space<vmem>>, vector<1x128x128xbf16>
    %20 = vector.shape_cast %19 : vector<1x128x128xbf16> to vector<128x128xbf16>
    %cst_16 = arith.constant dense<0.000000e+00> : vector<16x128xf32>
    %21 = tpu.matmul %18, %20, %cst_16 {dimension_numbers = #tpu.dot_dimension_numbers<[1], [0], [0], [1], [0, 0, 1, 1], [], []>} : vector<16x128xbf16>, vector<128x128xbf16>, vector<16x128xf32> -> vector<16x128xf32>
    %c1_17 = arith.constant 1 : index
    %c0_18 = arith.constant 0 : index
    %c0_19 = arith.constant 0 : index
    %22 = vector.load %arg5[%c1_17, %c0_18, %c0_19] : memref<2x1x128xf32, #tpu.memory_space<vmem>>, vector<1x1x128xf32>
    %23 = vector.shape_cast %22 : vector<1x1x128xf32> to vector<1x128xf32>
    %24 = vector.broadcast %23 : vector<1x128xf32> to vector<16x128xf32>
    %25 = arith.addf %21, %24 : vector<16x128xf32>
    %cst_20 = arith.constant 0.000000e+00 : f32
    %26 = vector.broadcast %cst_20 : f32 to vector<16x128xf32>
    %27 = arith.maximumf %25, %26 : vector<16x128xf32>
    %28 = arith.truncf %27 : vector<16x128xf32> to vector<16x128xbf16>
    %c0_21 = arith.constant 0 : index
    %c0_22 = arith.constant 0 : index
    %29 = vector.load %arg6[%c0_21, %c0_22] : memref<128x128xbf16, #tpu.memory_space<vmem>>, vector<128x128xbf16>
    %cst_23 = arith.constant dense<0.000000e+00> : vector<16x128xf32>
    %30 = tpu.matmul %28, %29, %cst_23 {dimension_numbers = #tpu.dot_dimension_numbers<[1], [0], [0], [1], [0, 0, 1, 1], [], []>} : vector<16x128xbf16>, vector<128x128xbf16>, vector<16x128xf32> -> vector<16x128xf32>
    %c0_24 = arith.constant 0 : index
    %c0_25 = arith.constant 0 : index
    %31 = vector.load %arg7[%c0_24, %c0_25] : memref<1x128xf32, #tpu.memory_space<vmem>>, vector<1x128xf32>
    %32 = vector.broadcast %31 : vector<1x128xf32> to vector<16x128xf32>
    %33 = arith.addf %30, %32 : vector<16x128xf32>
    %c0_26 = arith.constant 0 : index
    %c0_27 = arith.constant 0 : index
    %34 = vector.load %arg8[%c0_26, %c0_27] : memref<16x128xf32, #tpu.memory_space<vmem>>, vector<16x128xf32>
    tpu.vector_store %arg8[%c0_26, %c0_27], %33 {strides = array<i32>} : memref<16x128xf32, #tpu.memory_space<vmem>>, vector<16x128xf32>,
    return
  }
  func.func @transform_0(%arg0: i32) -> (i32, i32) {
    %c0_i32 = arith.constant 0 : i32
    %c0_i32_0 = arith.constant 0 : i32
    return %arg0, %c0_i32 : i32, i32
  }
  func.func @transform_1(%arg0: i32) -> (i32, i32) {
    %c0_i32 = arith.constant 0 : i32
    %c0_i32_0 = arith.constant 0 : i32
    %c0_i32_1 = arith.constant 0 : i32
    return %c0_i32, %c0_i32_0 : i32, i32
  }
  func.func @transform_2(%arg0: i32) -> (i32, i32) {
    %c0_i32 = arith.constant 0 : i32
    %c0_i32_0 = arith.constant 0 : i32
    %c0_i32_1 = arith.constant 0 : i32
    return %c0_i32, %c0_i32_0 : i32, i32
  }
  func.func @transform_3(%arg0: i32) -> (i32, i32, i32) {
    %c0_i32 = arith.constant 0 : i32
    %c0_i32_0 = arith.constant 0 : i32
    %c0_i32_1 = arith.constant 0 : i32
    %c0_i32_2 = arith.constant 0 : i32
    return %c0_i32, %c0_i32_0, %c0_i32_1 : i32, i32, i32
  }
  func.func @transform_4(%arg0: i32) -> (i32, i32, i32) {
    %c0_i32 = arith.constant 0 : i32
    %c0_i32_0 = arith.constant 0 : i32
    %c0_i32_1 = arith.constant 0 : i32
    %c0_i32_2 = arith.constant 0 : i32
    return %c0_i32, %c0_i32_0, %c0_i32_1 : i32, i32, i32
  }
  func.func @transform_5(%arg0: i32) -> (i32, i32) {
    %c0_i32 = arith.constant 0 : i32
    %c0_i32_0 = arith.constant 0 : i32
    %c0_i32_1 = arith.constant 0 : i32
    return %c0_i32, %c0_i32_0 : i32, i32
  }
  func.func @transform_6(%arg0: i32) -> (i32, i32) {
    %c0_i32 = arith.constant 0 : i32
    %c0_i32_0 = arith.constant 0 : i32
    %c0_i32_1 = arith.constant 0 : i32
    return %c0_i32, %c0_i32_0 : i32, i32
  }
  func.func @transform_7(%arg0: i32) -> (i32, i32) {
    %c0_i32 = arith.constant 0 : i32
    %c0_i32_0 = arith.constant 0 : i32
    return %arg0, %c0_i32 : i32, i32
  }
}

</mosaic_0001>

<bundles_post_ra>
// kernel: tpu_custom_call.1
= control target key start
LH: loop header
LB: loop body
LE: loop exit
PB: predicated region body
PF: predicated region fallthrough
CT: control target
= control target key end

     0   :  { %12 = vsyncpa [#allocation3], 0  ;;  %s1007_s0 = inlined_call_operand.hbm [shape: bf16[16,128], index: 0, kind: input, shape index: {}]   ;;  %s1008_s1 = inlined_call_operand.hbm [shape: bf16[128,128], index: 1, kind: input, shape index: {}]   ;;  %s1009_s2 = inlined_call_operand.vmem [shape: f32[1,128], index: 2, kind: input, shape index: {}]   ;;  %s1010_s3 = inlined_call_operand.hbm [shape: bf16[2,128,128], index: 3, kind: input, shape index: {}]   ;;  %s1011_s4 = inlined_call_operand.vmem [shape: f32[2,1,128], index: 4, kind: input, shape index: {}]   ;;  %s1012_s5 = inlined_call_operand.hbm [shape: bf16[128,128], index: 5, kind: input, shape index: {}]   ;;  %s1013_s6 = inlined_call_operand.vmem [shape: f32[1,128], index: 6, kind: input, shape index: {}]   ;;  %s1014_s7 = inlined_call_operand.hbm [shape: f32[16,128], index: 7, kind: output, shape index: {}]  }
   0x1   :  { %13 = vsyncpa [#allocation6], 0 }
   0x2   :  { %14 = vsyncpa [#allocation9], 0 }
   0x3   :  { %15 = vsyncpa [#allocation4], 0  ;;  %s877_s24 = smov [#allocation5]   ;;  %s878_s26 = smov [#allocation2]  }
   0x4   :  { %s33_s25 = sshll.u32 %s877_s24, 4  ;;  %s21_s27 = sshll.u32 %s878_s26, 4  ;;  %s34_s25 = int_to_ptr.vmem [resolvable:$true] %s33_s25  ;;  %s22_s27 = int_to_ptr.vmem [resolvable:$true] %s21_s27 }
   0x5   :  { %s777_s28 = scalar_lea.vmem %s34_s25, 1024  ;;  %p782_p1 = scmp.lt.s32.totalorder %s34_s25, %s34_s25 }
   0x6   :  { %p778_p0 = scmp.ne.s32.totalorder %s34_s25, %s777_s28  ;;  %p783_p2 = scmp.lt.s32.totalorder %s777_s28, %s777_s28 }
   0x8   :  { %p784_p3 = por %p783_p2, %p782_p1 }
   0xa   :  { %p785_p4 = pnand %p784_p3, %p778_p0 }
   0xc   :  { %788 = shalt.err (!%p785_p4)
}
   0xd   :  { %s879_s29 = smov 64   ;;  %s880_s30 = smov 4  }
   0xe   :  { %39 = dma.hbm_to_vmem [thread:$0]  %s1008_s1, 1024, %s34_s25, [#allocation6], %s879_s29, %s879_s29, %s880_s30  }
   0xf   :  { %s797_s10 = scalar_lea.vmem %s22_s27, 128  ;;  %p802_p6 = scmp.lt.s32.totalorder %s22_s27, %s22_s27 }
  0x10   :  { %p798_p5 = scmp.ne.s32.totalorder %s22_s27, %s797_s10  ;;  %p803_p7 = scmp.lt.s32.totalorder %s797_s10, %s797_s10 }
  0x12   :  { %p804_p8 = por %p803_p7, %p802_p6 }
  0x14   :  { %p805_p9 = pnand %p804_p8, %p798_p5 }
  0x16   :  { %808 = shalt.err (!%p805_p9)
}
  0x17   :  { %27 = dma.hbm_to_vmem [thread:$0]  %s1007_s0, 128, %s22_s27, [#allocation3], %s879_s29, %s879_s29, %s880_s30  }
  0x18   :  { %s881_s13 = smov [#allocation7]   ;;  %s882_s15 = smov [#allocation8]  }
  0x19   :  { %s47_s14 = sshll.u32 %s881_s13, 4  ;;  %s61_s16 = sshll.u32 %s882_s15, 4  ;;  %s48_s14 = int_to_ptr.vmem [resolvable:$true] %s47_s14  ;;  %s62_s16 = int_to_ptr.vmem [resolvable:$true] %s61_s16 }
  0x1a   :  { %s817_s1 = scalar_lea.vmem %s48_s14, 2048  ;;  %p822_p11 = scmp.lt.s32.totalorder %s48_s14, %s48_s14 }
  0x1b   :  { %p818_p10 = scmp.ne.s32.totalorder %s48_s14, %s817_s1  ;;  %p823_p12 = scmp.lt.s32.totalorder %s817_s1, %s817_s1 }
  0x1d   :  { %p824_p13 = por %p823_p12, %p822_p11 }
  0x1f   :  { %p825_p0 = pnand %p824_p13, %p818_p10 }
  0x21   :  { %828 = shalt.err (!%p825_p0)
}
  0x22   :  { %53 = dma.hbm_to_vmem [thread:$0]  %s1010_s3, 2048, %s48_s14, [#allocation6], %s879_s29, %s879_s29, %s880_s30  }
  0x23   :  { %s837_s0 = scalar_lea.vmem %s62_s16, 1024  ;;  %p842_p2 = scmp.lt.s32.totalorder %s62_s16, %s62_s16 }
  0x24   :  { %p838_p1 = scmp.ne.s32.totalorder %s62_s16, %s837_s0  ;;  %p843_p3 = scmp.lt.s32.totalorder %s837_s0, %s837_s0 }
  0x26   :  { %p844_p4 = por %p843_p3, %p842_p2 }
  0x28   :  { %p845_p5 = pnand %p844_p4, %p838_p1 }
  0x2a   :  { %848 = shalt.err (!%p845_p5)
}
  0x2b   :  { %67 = dma.hbm_to_vmem [thread:$0]  %s1012_s5, 1024, %s62_s16, [#allocation9], %s879_s29, %s879_s29, %s880_s30  }
  0x2c   :  { %869 = dma.done.wait [#allocation3], 128  }
  0x2d   :  { %870 = vsyncadd [#allocation3], 4294967168 }
  0x2e   :  { %871 = dma.done.wait [#allocation6], 3072  }
  0x2f   :  { %872 = vsyncadd [#allocation6], 4294964224 }
  0x30   :  { %873 = dma.done.wait [#allocation9], 1024  }
  0x31   :  { %874 = vsyncadd [#allocation9], 4294966272  ;;  %v883_v0 = vmov 0.0   ;;  %vm884_vm0 = vmmov 0   ;;  %v736_v1 = vld [vmem:[#allocation5 + $0x38] sm:$0xff]   ;;  %v737_v2 = vld [vmem:[#allocation5 + $0x30] sm:$0xff]  }
  0x32   :  { %645 = vmatprep.subr.bf16.mxu0 %v883_v0  ;;  %661 = vmatprep.mubr.msk.bf16.mxu0 %vm884_vm0, %v883_v0  ;;  %v738_v3 = vld [vmem:[#allocation5 + $0x28] sm:$0xff]   ;;  %v745_v4 = vld [vmem:[#allocation7 + $0x38] sm:$0xff]   ;;  %v739_v5 = vld [vmem:[#allocation5 + $0x20] sm:$0xff]   ;;  %s885_s26 = smov [#allocation10]  }
  0x33   :  { %665 = vmatprep.subr.bf16.mxu1 %v883_v0  ;;  %681 = vmatprep.mubr.msk.bf16.mxu1 %vm884_vm0, %v883_v0  ;;  %v746_v6 = vld [vmem:[#allocation7 + $0x30] sm:$0xff]   ;;  %v740_v7 = vld [vmem:[#allocation5 + $0x18] sm:$0xff]   ;;  %v747_v8 = vld [vmem:[#allocation7 + $0x28] sm:$0xff]   ;;  %s557_s27 = sshll.u32 %s885_s26, 4  ;;  %s558_s27 = int_to_ptr.vmem [resolvable:$true] %s557_s27 }
  0x34   :  { %646 = vmatpush3.bf16.msra.mxu0 %v736_v1  ;;  %666 = vmatpush3.bf16.msra.mxu1 %v745_v4  ;;  %v741_v9 = vld [vmem:[#allocation5 + $0x10] sm:$0xff]   ;;  %v748_v10 = vld [vmem:[#allocation7 + $0x20] sm:$0xff]   ;;  %v742_v11 = vld [vmem:[#allocation5 + $0x8] sm:$0xff]   ;;  %p854_p7 = scmp.lt.s32.totalorder %s558_s27, %s558_s27 }
  0x35   :  { %647 = vmatprep.subr.bf16.mxu0 %v883_v0  ;;  %667 = vmatprep.subr.bf16.mxu1 %v883_v0  ;;  %v749_v12 = vld [vmem:[#allocation7 + $0x18] sm:$0xff]   ;;  %v743_v13 = vld [vmem:[#allocation5] sm:$0xff]   ;;  %v750_v15 = vld [vmem:[#allocation7 + $0x10] sm:$0xff]  }
  0x36   :  { %v744_v14 = vld [vmem:[#allocation2] sm:$0xff]   ;;  %v751_v16 = vld [vmem:[#allocation7 + $0x8] sm:$0xff]   ;;  %v752_v17 = vld [vmem:[#allocation7] sm:$0xff]  }
  0x37   :  { %v753_v18 = vld [vmem:[#allocation7 + $0x78] sm:$0xff]   ;;  %v754_v19 = vld [vmem:[#allocation7 + $0x70] sm:$0xff]   ;;  %v755_v20 = vld [vmem:[#allocation7 + $0x68] sm:$0xff]  }
  0x38   :  { %648 = vmatpush3.bf16.msra.mxu0 %v737_v2  ;;  %668 = vmatpush3.bf16.msra.mxu1 %v746_v6  ;;  %v756_v21 = vld [vmem:[#allocation7 + $0x60] sm:$0xff]   ;;  %v757_v22 = vld [vmem:[#allocation7 + $0x58] sm:$0xff]   ;;  %v758_v33 = vld [vmem:[#allocation7 + $0x50] sm:$0xff]  }
  0x39   :  { %649 = vmatprep.subr.bf16.mxu0 %v883_v0  ;;  %669 = vmatprep.subr.bf16.mxu1 %v883_v0  ;;  %v571_v23 = vld [vmem:[%s1009_s2] ss:$0 sm:$0xff]  ;;  %v759_v34 = vld [vmem:[#allocation7 + $0x48] sm:$0xff]   ;;  %v760_v35 = vld [vmem:[#allocation7 + $0x40] sm:$0xff]  }
  0x3a   :  { %v761_v36 = vld [vmem:[#allocation8 + $0x38] sm:$0xff]   ;;  %v762_v37 = vld [vmem:[#allocation8 + $0x30] sm:$0xff]   ;;  %v763_v38 = vld [vmem:[#allocation8 + $0x28] sm:$0xff]  }
  0x3b   :  { %v764_v39 = vld [vmem:[#allocation8 + $0x20] sm:$0xff]   ;;  %v765_v40 = vld [vmem:[#allocation8 + $0x18] sm:$0xff]   ;;  %v766_v51 = vld [vmem:[#allocation8 + $0x10] sm:$0xff]  }
  0x3c   :  { %650 = vmatpush3.bf16.msra.mxu0 %v738_v3  ;;  %670 = vmatpush3.bf16.msra.mxu1 %v747_v8  ;;  %v581_v41 = vld [vmem:[%s1011_s4] ss:$0 sm:$0xff]  ;;  %v767_v52 = vld [vmem:[#allocation8 + $0x8] sm:$0xff]   ;;  %v768_v53 = vld [vmem:[#allocation8] sm:$0xff]  }
  0x3d   :  { %651 = vmatprep.subr.bf16.mxu0 %v883_v0  ;;  %671 = vmatprep.subr.bf16.mxu1 %v883_v0  ;;  %v591_v54 = vld [vmem:[%s1011_s4 + $0x1] ss:$0 sm:$0xff]  ;;  %s849_s4 = scalar_lea.vmem %s558_s27, 256 }
  0x3e   :  { %p850_p6 = scmp.ne.s32.totalorder %s558_s27, %s849_s4  ;;  %p855_p8 = scmp.lt.s32.totalorder %s849_s4, %s849_s4 }
  0x40   :  { %652 = vmatpush3.bf16.msra.mxu0 %v739_v5  ;;  %672 = vmatpush3.bf16.msra.mxu1 %v748_v10  ;;  %p856_p9 = por %p855_p8, %p854_p7 }
  0x41   :  { %653 = vmatprep.subr.bf16.mxu0 %v883_v0  ;;  %673 = vmatprep.subr.bf16.mxu1 %v883_v0 }
  0x42   :  { %p857_p10 = pnand %p856_p9, %p850_p6 }
  0x44   :  { %654 = vmatpush3.bf16.msra.mxu0 %v740_v7  ;;  %674 = vmatpush3.bf16.msra.mxu1 %v749_v12 }
  0x45   :  { %655 = vmatprep.subr.bf16.mxu0 %v883_v0  ;;  %675 = vmatprep.subr.bf16.mxu1 %v883_v0 }
  0x48   :  { %656 = vmatpush3.bf16.msra.mxu0 %v741_v9  ;;  %676 = vmatpush3.bf16.msra.mxu1 %v750_v15 }
  0x49   :  { %657 = vmatprep.subr.bf16.mxu0 %v883_v0  ;;  %677 = vmatprep.subr.bf16.mxu1 %v883_v0 }
  0x4c   :  { %658 = vmatpush3.bf16.msra.mxu0 %v742_v11  ;;  %678 = vmatpush3.bf16.msra.mxu1 %v751_v16 }
  0x4d   :  { %659 = vmatprep.subr.bf16.mxu0 %v883_v0  ;;  %679 = vmatprep.subr.bf16.mxu1 %v883_v0 }
  0x50   :  { %660 = vmatpush3.bf16.msra.mxu0 %v743_v13  ;;  %680 = vmatpush3.bf16.msra.mxu1 %v752_v17 }
  0x51   :  { %685 = vmatprep.subr.bf16.mxu0 %v883_v0  ;;  %705 = vmatprep.subr.bf16.mxu1 %v883_v0 }
  0x53   :  { %662 = vmatmul.mubr.bf16.vlgmr.msra.gmra.mxu0 %v744_v14 }
  0x54   :  { %701 = vmatprep.mubr.msk.bf16.mxu0 %vm884_vm0, %v883_v0  ;;  %686 = vmatpush3.bf16.msra.mxu0 %v753_v18 }
  0x55   :  { %687 = vmatprep.subr.bf16.mxu0 %v883_v0 }
  0x58   :  { %688 = vmatpush3.bf16.msra.mxu0 %v754_v19 }
  0x59   :  { %689 = vmatprep.subr.bf16.mxu0 %v883_v0 }
  0x5c   :  { %690 = vmatpush3.bf16.msra.mxu0 %v755_v20 }
  0x5d   :  { %691 = vmatprep.subr.bf16.mxu0 %v883_v0 }
  0x60   :  { %692 = vmatpush3.bf16.msra.mxu0 %v756_v21 }
  0x61   :  { %693 = vmatprep.subr.bf16.mxu0 %v883_v0 }
  0x64   :  { %694 = vmatpush3.bf16.msra.mxu0 %v757_v22 }
  0x65   :  { %695 = vmatprep.subr.bf16.mxu0 %v883_v0 }
  0x68   :  { %696 = vmatpush3.bf16.msra.mxu0 %v758_v33 }
  0x69   :  { %697 = vmatprep.subr.bf16.mxu0 %v883_v0 }
  0x6c   :  { %698 = vmatpush3.bf16.msra.mxu0 %v759_v34 }
  0x6d   :  { %699 = vmatprep.subr.bf16.mxu0 %v883_v0 }
  0x70   :  { %700 = vmatpush3.bf16.msra.mxu0 %v760_v35 }
 0x113   :  { %v196_v24 = vpop.f32.mrf.mxu0 }
 0x114   :  { %v197_v26 = vadd.f32 %v571_v23, %v196_v24 }
 0x115   :  { %v663_v25 = vpop.f32.mrf.mxu0 }
 0x116   :  { %v203_v30 = vmax.f32 %v197_v26, 0.0 }
 0x117   :  { %v199_v27 = vpop.f32.mrf.mxu0 }
 0x118   :  { %v200_v28 = vadd.f32 %v571_v23, %v199_v27 }
 0x119   :  { %v664_v29 = vpop.f32.mrf.mxu0 }
 0x11a   :  { %v204_v31 = vmax.f32 %v200_v28, 0.0 }
 0x11c   :  { %v205_v32 = vpack.c.bf16 %v204_v31, %v203_v30 }
 0x11e   :  { %682 = vmatmul.mubr.bf16.vlgmr.msra.gmra.mxu1 %v205_v32 }
 0x11f   :  { %721 = vmatprep.mubr.msk.bf16.mxu1 %vm884_vm0, %v883_v0  ;;  %706 = vmatpush3.bf16.msra.mxu1 %v761_v36 }
 0x120   :  { %707 = vmatprep.subr.bf16.mxu1 %v883_v0 }
 0x123   :  { %708 = vmatpush3.bf16.msra.mxu1 %v762_v37 }
 0x124   :  { %709 = vmatprep.subr.bf16.mxu1 %v883_v0 }
 0x127   :  { %710 = vmatpush3.bf16.msra.mxu1 %v763_v38 }
 0x128   :  { %711 = vmatprep.subr.bf16.mxu1 %v883_v0 }
 0x12b   :  { %712 = vmatpush3.bf16.msra.mxu1 %v764_v39 }
 0x12c   :  { %713 = vmatprep.subr.bf16.mxu1 %v883_v0 }
 0x12f   :  { %714 = vmatpush3.bf16.msra.mxu1 %v765_v40 }
 0x130   :  { %715 = vmatprep.subr.bf16.mxu1 %v883_v0 }
 0x133   :  { %716 = vmatpush3.bf16.msra.mxu1 %v766_v51 }
 0x134   :  { %717 = vmatprep.subr.bf16.mxu1 %v883_v0 }
 0x137   :  { %718 = vmatpush3.bf16.msra.mxu1 %v767_v52 }
 0x138   :  { %719 = vmatprep.subr.bf16.mxu1 %v883_v0  ;;  %v600_v0 = vld [vmem:[%s1013_s6] ss:$0 sm:$0xff] }
 0x13b   :  { %720 = vmatpush3.bf16.msra.mxu1 %v768_v53 }
 0x1de   :  { %v311_v42 = vpop.f32.mrf.mxu1 }
 0x1df   :  { %v312_v44 = vadd.f32 %v581_v41, %v311_v42 }
 0x1e0   :  { %v683_v43 = vpop.f32.mrf.mxu1 }
 0x1e1   :  { %v318_v48 = vmax.f32 %v312_v44, 0.0 }
 0x1e2   :  { %v314_v45 = vpop.f32.mrf.mxu1 }
 0x1e3   :  { %v315_v46 = vadd.f32 %v581_v41, %v314_v45 }
 0x1e4   :  { %v684_v47 = vpop.f32.mrf.mxu1 }
 0x1e5   :  { %v319_v49 = vmax.f32 %v315_v46, 0.0 }
 0x1e7   :  { %v320_v50 = vpack.c.bf16 %v319_v49, %v318_v48 }
 0x1e9   :  { %702 = vmatmul.mubr.bf16.vlgmr.msra.gmra.mxu0 %v320_v50 }
 0x2a9   :  { %v428_v55 = vpop.f32.mrf.mxu0 }
 0x2aa   :  { %v429_v57 = vadd.f32 %v591_v54, %v428_v55 }
 0x2ab   :  { %v703_v56 = vpop.f32.mrf.mxu0 }
 0x2ac   :  { %v435_v61 = vmax.f32 %v429_v57, 0.0 }
 0x2ad   :  { %v431_v58 = vpop.f32.mrf.mxu0 }
 0x2ae   :  { %v432_v59 = vadd.f32 %v591_v54, %v431_v58 }
 0x2af   :  { %v704_v60 = vpop.f32.mrf.mxu0 }
 0x2b0   :  { %v436_v62 = vmax.f32 %v432_v59, 0.0 }
 0x2b2   :  { %v437_v63 = vpack.c.bf16 %v436_v62, %v435_v61 }
 0x2b4   :  { %722 = vmatmul.mubr.bf16.vlgmr.msra.gmra.mxu1 %v437_v63 }
 0x374   :  { %v543_v1 = vpop.f32.mrf.mxu1 }
 0x375   :  { %v544_v2 = vadd.f32 %v600_v0, %v543_v1 }
 0x376   :  { %v723_v3 = vpop.f32.mrf.mxu1 }
 0x377   :  { %550 = vst [vmem:[#allocation10] sm:$0xff] %v544_v2 }
 0x378   :  { %v546_v4 = vpop.f32.mrf.mxu1 }
 0x379   :  { %v547_v5 = vadd.f32 %v600_v0, %v546_v4 }
 0x37a   :  { %v724_v6 = vpop.f32.mrf.mxu1 }
 0x37b   :  { %551 = vst [vmem:[#allocation10 + $0x8] sm:$0xff] %v547_v5 }
 0x37c   :  { %860 = shalt.err (!%p857_p10)
}
 0x37d   :  { %s886_s28 = smov 128   ;;  %s887_s6 = smov 8  }
 0x37e   :  { %563 = dma.vmem_to_hbm [thread:$0]  %s558_s27, 256, %s1014_s7, [#allocation4], %s886_s28, %s886_s28, %s887_s6  }
 0x37f   :  { %875 = dma.done.wait [#allocation4], 256  }
 0x380   :  { %876 = vsyncadd [#allocation4], 4294967040 }
 0x381   :  { %567 = vsyncpa [#allocation3], 1 }
 0x382   :  { %568 = vsyncpa [#allocation6], 1 }
 0x383   :  { %569 = vsyncpa [#allocation9], 1 }
 0x384   :  { %570 = vsyncpa [#allocation4], 1 }

// kernel: tpu_custom_call.1
= control target key start
LH: loop header
LB: loop body
LE: loop exit
PB: predicated region body
PF: predicated region fallthrough
CT: control target
= control target key end

     0   :  { %12 = vsyncpa [#allocation3], 0  ;;  %s1007_s0 = inlined_call_operand.hbm [shape: bf16[16,128], index: 0, kind: input, shape index: {}]   ;;  %s1008_s1 = inlined_call_operand.hbm [shape: bf16[128,128], index: 1, kind: input, shape index: {}]   ;;  %s1009_s2 = inlined_call_operand.vmem [shape: f32[1,128], index: 2, kind: input, shape index: {}]   ;;  %s1010_s3 = inlined_call_operand.hbm [shape: bf16[2,128,128], index: 3, kind: input, shape index: {}]   ;;  %s1011_s4 = inlined_call_operand.vmem [shape: f32[2,1,128], index: 4, kind: input, shape index: {}]   ;;  %s1012_s5 = inlined_call_operand.hbm [shape: bf16[128,128], index: 5, kind: input, shape index: {}]   ;;  %s1013_s6 = inlined_call_operand.vmem [shape: f32[1,128], index: 6, kind: input, shape index: {}]   ;;  %s1014_s7 = inlined_call_operand.hbm [shape: f32[16,128], index: 7, kind: output, shape index: {}]  }
   0x1   :  { %13 = vsyncpa [#allocation6], 0 }
   0x2   :  { %14 = vsyncpa [#allocation9], 0 }
   0x3   :  { %15 = vsyncpa [#allocation4], 0  ;;  %s877_s24 = smov [#allocation5]   ;;  %s878_s26 = smov [#allocation2]  }
   0x4   :  { %s33_s25 = sshll.u32 %s877_s24, 4  ;;  %s21_s27 = sshll.u32 %s878_s26, 4  ;;  %s34_s25 = int_to_ptr.vmem [resolvable:$true] %s33_s25  ;;  %s22_s27 = int_to_ptr.vmem [resolvable:$true] %s21_s27 }
   0x5   :  { %s777_s28 = scalar_lea.vmem %s34_s25, 1024  ;;  %p782_p1 = scmp.lt.s32.totalorder %s34_s25, %s34_s25 }
   0x6   :  { %p778_p0 = scmp.ne.s32.totalorder %s34_s25, %s777_s28  ;;  %p783_p2 = scmp.lt.s32.totalorder %s777_s28, %s777_s28 }
   0x8   :  { %p784_p3 = por %p783_p2, %p782_p1 }
   0xa   :  { %p785_p4 = pnand %p784_p3, %p778_p0 }
   0xc   :  { %788 = shalt.err (!%p785_p4)
}
   0xd   :  { %s879_s29 = smov 64   ;;  %s880_s30 = smov 4  }
   0xe   :  { %39 = dma.hbm_to_vmem [thread:$0]  %s1008_s1, 1024, %s34_s25, [#allocation6], %s879_s29, %s879_s29, %s880_s30  }
   0xf   :  { %s797_s10 = scalar_lea.vmem %s22_s27, 128  ;;  %p802_p6 = scmp.lt.s32.totalorder %s22_s27, %s22_s27 }
  0x10   :  { %p798_p5 = scmp.ne.s32.totalorder %s22_s27, %s797_s10  ;;  %p803_p7 = scmp.lt.s32.totalorder %s797_s10, %s797_s10 }
  0x12   :  { %p804_p8 = por %p803_p7, %p802_p6 }
  0x14   :  { %p805_p9 = pnand %p804_p8, %p798_p5 }
  0x16   :  { %808 = shalt.err (!%p805_p9)
}
  0x17   :  { %27 = dma.hbm_to_vmem [thread:$0]  %s1007_s0, 128, %s22_s27, [#allocation3], %s879_s29, %s879_s29, %s880_s30  }
  0x18   :  { %s881_s13 = smov [#allocation7]   ;;  %s882_s15 = smov [#allocation8]  }
  0x19   :  { %s47_s14 = sshll.u32 %s881_s13, 4  ;;  %s61_s16 = sshll.u32 %s882_s15, 4  ;;  %s48_s14 = int_to_ptr.vmem [resolvable:$true] %s47_s14  ;;  %s62_s16 = int_to_ptr.vmem [resolvable:$true] %s61_s16 }
  0x1a   :  { %s817_s1 = scalar_lea.vmem %s48_s14, 2048  ;;  %p822_p11 = scmp.lt.s32.totalorder %s48_s14, %s48_s14 }
  0x1b   :  { %p818_p10 = scmp.ne.s32.totalorder %s48_s14, %s817_s1  ;;  %p823_p12 = scmp.lt.s32.totalorder %s817_s1, %s817_s1 }
  0x1d   :  { %p824_p13 = por %p823_p12, %p822_p11 }
  0x1f   :  { %p825_p0 = pnand %p824_p13, %p818_p10 }
  0x21   :  { %828 = shalt.err (!%p825_p0)
}
  0x22   :  { %53 = dma.hbm_to_vmem [thread:$0]  %s1010_s3, 2048, %s48_s14, [#allocation6], %s879_s29, %s879_s29, %s880_s30  }
  0x23   :  { %s837_s0 = scalar_lea.vmem %s62_s16, 1024  ;;  %p842_p2 = scmp.lt.s32.totalorder %s62_s16, %s62_s16 }
  0x24   :  { %p838_p1 = scmp.ne.s32.totalorder %s62_s16, %s837_s0  ;;  %p843_p3 = scmp.lt.s32.totalorder %s837_s0, %s837_s0 }
  0x26   :  { %p844_p4 = por %p843_p3, %p842_p2 }
  0x28   :  { %p845_p5 = pnand %p844_p4, %p838_p1 }
  0x2a   :  { %848 = shalt.err (!%p845_p5)
}
  0x2b   :  { %67 = dma.hbm_to_vmem [thread:$0]  %s1012_s5, 1024, %s62_s16, [#allocation9], %s879_s29, %s879_s29, %s880_s30  }
  0x2c   :  { %869 = dma.done.wait [#allocation3], 128  }
  0x2d   :  { %870 = vsyncadd [#allocation3], 4294967168 }
  0x2e   :  { %871 = dma.done.wait [#allocation6], 3072  }
  0x2f   :  { %872 = vsyncadd [#allocation6], 4294964224 }
  0x30   :  { %873 = dma.done.wait [#allocation9], 1024  }
  0x31   :  { %874 = vsyncadd [#allocation9], 4294966272  ;;  %v883_v0 = vmov 0.0   ;;  %vm884_vm0 = vmmov 0   ;;  %v736_v1 = vld [vmem:[#allocation5 + $0x38] sm:$0xff]   ;;  %v737_v2 = vld [vmem:[#allocation5 + $0x30] sm:$0xff]  }
  0x32   :  { %645 = vmatprep.subr.bf16.mxu0 %v883_v0  ;;  %661 = vmatprep.mubr.msk.bf16.mxu0 %vm884_vm0, %v883_v0  ;;  %v738_v3 = vld [vmem:[#allocation5 + $0x28] sm:$0xff]   ;;  %v745_v4 = vld [vmem:[#allocation7 + $0x38] sm:$0xff]   ;;  %v739_v5 = vld [vmem:[#allocation5 + $0x20] sm:$0xff]   ;;  %s885_s26 = smov [#allocation10]  }
  0x33   :  { %665 = vmatprep.subr.bf16.mxu1 %v883_v0  ;;  %681 = vmatprep.mubr.msk.bf16.mxu1 %vm884_vm0, %v883_v0  ;;  %v746_v6 = vld [vmem:[#allocation7 + $0x30] sm:$0xff]   ;;  %v740_v7 = vld [vmem:[#allocation5 + $0x18] sm:$0xff]   ;;  %v747_v8 = vld [vmem:[#allocation7 + $0x28] sm:$0xff]   ;;  %s557_s27 = sshll.u32 %s885_s26, 4  ;;  %s558_s27 = int_to_ptr.vmem [resolvable:$true] %s557_s27 }
  0x34   :  { %646 = vmatpush3.bf16.msra.mxu0 %v736_v1  ;;  %666 = vmatpush3.bf16.msra.mxu1 %v745_v4  ;;  %v741_v9 = vld [vmem:[#allocation5 + $0x10] sm:$0xff]   ;;  %v748_v10 = vld [vmem:[#allocation7 + $0x20] sm:$0xff]   ;;  %v742_v11 = vld [vmem:[#allocation5 + $0x8] sm:$0xff]   ;;  %p854_p7 = scmp.lt.s32.totalorder %s558_s27, %s558_s27 }
  0x35   :  { %647 = vmatprep.subr.bf16.mxu0 %v883_v0  ;;  %667 = vmatprep.subr.bf16.mxu1 %v883_v0  ;;  %v749_v12 = vld [vmem:[#allocation7 + $0x18] sm:$0xff]   ;;  %v743_v13 = vld [vmem:[#allocation5] sm:$0xff]   ;;  %v750_v15 = vld [vmem:[#allocation7 + $0x10] sm:$0xff]  }
  0x36   :  { %v744_v14 = vld [vmem:[#allocation2] sm:$0xff]   ;;  %v751_v16 = vld [vmem:[#allocation7 + $0x8] sm:$0xff]   ;;  %v752_v17 = vld [vmem:[#allocation7] sm:$0xff]  }
  0x37   :  { %v753_v18 = vld [vmem:[#allocation7 + $0x78] sm:$0xff]   ;;  %v754_v19 = vld [vmem:[#allocation7 + $0x70] sm:$0xff]   ;;  %v755_v20 = vld [vmem:[#allocation7 + $0x68] sm:$0xff]  }
  0x38   :  { %648 = vmatpush3.bf16.msra.mxu0 %v737_v2  ;;  %668 = vmatpush3.bf16.msra.mxu1 %v746_v6  ;;  %v756_v21 = vld [vmem:[#allocation7 + $0x60] sm:$0xff]   ;;  %v757_v22 = vld [vmem:[#allocation7 + $0x58] sm:$0xff]   ;;  %v758_v33 = vld [vmem:[#allocation7 + $0x50] sm:$0xff]  }
  0x39   :  { %649 = vmatprep.subr.bf16.mxu0 %v883_v0  ;;  %669 = vmatprep.subr.bf16.mxu1 %v883_v0  ;;  %v571_v23 = vld [vmem:[%s1009_s2] ss:$0 sm:$0xff]  ;;  %v759_v34 = vld [vmem:[#allocation7 + $0x48] sm:$0xff]   ;;  %v760_v35 = vld [vmem:[#allocation7 + $0x40] sm:$0xff]  }
  0x3a   :  { %v761_v36 = vld [vmem:[#allocation8 + $0x38] sm:$0xff]   ;;  %v762_v37 = vld [vmem:[#allocation8 + $0x30] sm:$0xff]   ;;  %v763_v38 = vld [vmem:[#allocation8 + $0x28] sm:$0xff]  }
  0x3b   :  { %v764_v39 = vld [vmem:[#allocation8 + $0x20] sm:$0xff]   ;;  %v765_v40 = vld [vmem:[#allocation8 + $0x18] sm:$0xff]   ;;  %v766_v51 = vld [vmem:[#allocation8 + $0x10] sm:$0xff]  }
  0x3c   :  { %650 = vmatpush3.bf16.msra.mxu0 %v738_v3  ;;  %670 = vmatpush3.bf16.msra.mxu1 %v747_v8  ;;  %v581_v41 = vld [vmem:[%s1011_s4] ss:$0 sm:$0xff]  ;;  %v767_v52 = vld [vmem:[#allocation8 + $0x8] sm:$0xff]   ;;  %v768_v53 = vld [vmem:[#allocation8] sm:$0xff]  }
  0x3d   :  { %651 = vmatprep.subr.bf16.mxu0 %v883_v0  ;;  %671 = vmatprep.subr.bf16.mxu1 %v883_v0  ;;  %v591_v54 = vld [vmem:[%s1011_s4 + $0x1] ss:$0 sm:$0xff]  ;;  %s849_s4 = scalar_lea.vmem %s558_s27, 256 }
  0x3e   :  { %p850_p6 = scmp.ne.s32.totalorder %s558_s27, %s849_s4  ;;  %p855_p8 = scmp.lt.s32.totalorder %s849_s4, %s849_s4 }
  0x40   :  { %652 = vmatpush3.bf16.msra.mxu0 %v739_v5  ;;  %672 = vmatpush3.bf16.msra.mxu1 %v748_v10  ;;  %p856_p9 = por %p855_p8, %p854_p7 }
  0x41   :  { %653 = vmatprep.subr.bf16.mxu0 %v883_v0  ;;  %673 = vmatprep.subr.bf16.mxu1 %v883_v0 }
  0x42   :  { %p857_p10 = pnand %p856_p9, %p850_p6 }
  0x44   :  { %654 = vmatpush3.bf16.msra.mxu0 %v740_v7  ;;  %674 = vmatpush3.bf16.msra.mxu1 %v749_v12 }
  0x45   :  { %655 = vmatprep.subr.bf16.mxu0 %v883_v0  ;;  %675 = vmatprep.subr.bf16.mxu1 %v883_v0 }
  0x48   :  { %656 = vmatpush3.bf16.msra.mxu0 %v741_v9  ;;  %676 = vmatpush3.bf16.msra.mxu1 %v750_v15 }
  0x49   :  { %657 = vmatprep.subr.bf16.mxu0 %v883_v0  ;;  %677 = vmatprep.subr.bf16.mxu1 %v883_v0 }
  0x4c   :  { %658 = vmatpush3.bf16.msra.mxu0 %v742_v11  ;;  %678 = vmatpush3.bf16.msra.mxu1 %v751_v16 }
  0x4d   :  { %659 = vmatprep.subr.bf16.mxu0 %v883_v0  ;;  %679 = vmatprep.subr.bf16.mxu1 %v883_v0 }
  0x50   :  { %660 = vmatpush3.bf16.msra.mxu0 %v743_v13  ;;  %680 = vmatpush3.bf16.msra.mxu1 %v752_v17 }
  0x51   :  { %685 = vmatprep.subr.bf16.mxu0 %v883_v0  ;;  %705 = vmatprep.subr.bf16.mxu1 %v883_v0 }
  0x53   :  { %662 = vmatmul.mubr.bf16.vlgmr.msra.gmra.mxu0 %v744_v14 }
  0x54   :  { %701 = vmatprep.mubr.msk.bf16.mxu0 %vm884_vm0, %v883_v0  ;;  %686 = vmatpush3.bf16.msra.mxu0 %v753_v18 }
  0x55   :  { %687 = vmatprep.subr.bf16.mxu0 %v883_v0 }
  0x58   :  { %688 = vmatpush3.bf16.msra.mxu0 %v754_v19 }
  0x59   :  { %689 = vmatprep.subr.bf16.mxu0 %v883_v0 }
  0x5c   :  { %690 = vmatpush3.bf16.msra.mxu0 %v755_v20 }
  0x5d   :  { %691 = vmatprep.subr.bf16.mxu0 %v883_v0 }
  0x60   :  { %692 = vmatpush3.bf16.msra.mxu0 %v756_v21 }
  0x61   :  { %693 = vmatprep.subr.bf16.mxu0 %v883_v0 }
  0x64   :  { %694 = vmatpush3.bf16.msra.mxu0 %v757_v22 }
  0x65   :  { %695 = vmatprep.subr.bf16.mxu0 %v883_v0 }
  0x68   :  { %696 = vmatpush3.bf16.msra.mxu0 %v758_v33 }
  0x69   :  { %697 = vmatprep.subr.bf16.mxu0 %v883_v0 }
  0x6c   :  { %698 = vmatpush3.bf16.msra.mxu0 %v759_v34 }
  0x6d   :  { %699 = vmatprep.subr.bf16.mxu0 %v883_v0 }
  0x70   :  { %700 = vmatpush3.bf16.msra.mxu0 %v760_v35 }
 0x113   :  { %v196_v24 = vpop.f32.mrf.mxu0 }
 0x114   :  { %v197_v26 = vadd.f32 %v571_v23, %v196_v24 }
 0x115   :  { %v663_v25 = vpop.f32.mrf.mxu0 }
 0x116   :  { %v203_v30 = vmax.f32 %v197_v26, 0.0 }
 0x117   :  { %v199_v27 = vpop.f32.mrf.mxu0 }
 0x118   :  { %v200_v28 = vadd.f32 %v571_v23, %v199_v27 }
 0x119   :  { %v664_v29 = vpop.f32.mrf.mxu0 }
 0x11a   :  { %v204_v31 = vmax.f32 %v200_v28, 0.0 }
 0x11c   :  { %v205_v32 = vpack.c.bf16 %v204_v31, %v203_v30 }
 0x11e   :  { %682 = vmatmul.mubr.bf16.vlgmr.msra.gmra.mxu1 %v205_v32 }
 0x11f   :  { %721 = vmatprep.mubr.msk.bf16.mxu1 %vm884_vm0, %v883_v0  ;;  %706 = vmatpush3.bf16.msra.mxu1 %v761_v36 }
 0x120   :  { %707 = vmatprep.subr.bf16.mxu1 %v883_v0 }
 0x123   :  { %708 = vmatpush3.bf16.msra.mxu1 %v762_v37 }
 0x124   :  { %709 = vmatprep.subr.bf16.mxu1 %v883_v0 }
 0x127   :  { %710 = vmatpush3.bf16.msra.mxu1 %v763_v38 }
 0x128   :  { %711 = vmatprep.subr.bf16.mxu1 %v883_v0 }
 0x12b   :  { %712 = vmatpush3.bf16.msra.mxu1 %v764_v39 }
 0x12c   :  { %713 = vmatprep.subr.bf16.mxu1 %v883_v0 }
 0x12f   :  { %714 = vmatpush3.bf16.msra.mxu1 %v765_v40 }
 0x130   :  { %715 = vmatprep.subr.bf16.mxu1 %v883_v0 }
 0x133   :  { %716 = vmatpush3.bf16.msra.mxu1 %v766_v51 }
 0x134   :  { %717 = vmatprep.subr.bf16.mxu1 %v883_v0 }
 0x137   :  { %718 = vmatpush3.bf16.msra.mxu1 %v767_v52 }
 0x138   :  { %719 = vmatprep.subr.bf16.mxu1 %v883_v0  ;;  %v600_v0 = vld [vmem:[%s1013_s6] ss:$0 sm:$0xff] }
 0x13b   :  { %720 = vmatpush3.bf16.msra.mxu1 %v768_v53 }
 0x1de   :  { %v311_v42 = vpop.f32.mrf.mxu1 }
 0x1df   :  { %v312_v44 = vadd.f32 %v581_v41, %v311_v42 }
 0x1e0   :  { %v683_v43 = vpop.f32.mrf.mxu1 }
 0x1e1   :  { %v318_v48 = vmax.f32 %v312_v44, 0.0 }
 0x1e2   :  { %v314_v45 = vpop.f32.mrf.mxu1 }
 0x1e3   :  { %v315_v46 = vadd.f32 %v581_v41, %v314_v45 }
 0x1e4   :  { %v684_v47 = vpop.f32.mrf.mxu1 }
 0x1e5   :  { %v319_v49 = vmax.f32 %v315_v46, 0.0 }
 0x1e7   :  { %v320_v50 = vpack.c.bf16 %v319_v49, %v318_v48 }
 0x1e9   :  { %702 = vmatmul.mubr.bf16.vlgmr.msra.gmra.mxu0 %v320_v50 }
 0x2a9   :  { %v428_v55 = vpop.f32.mrf.mxu0 }
 0x2aa   :  { %v429_v57 = vadd.f32 %v591_v54, %v428_v55 }
 0x2ab   :  { %v703_v56 = vpop.f32.mrf.mxu0 }
 0x2ac   :  { %v435_v61 = vmax.f32 %v429_v57, 0.0 }
 0x2ad   :  { %v431_v58 = vpop.f32.mrf.mxu0 }
 0x2ae   :  { %v432_v59 = vadd.f32 %v591_v54, %v431_v58 }
 0x2af   :  { %v704_v60 = vpop.f32.mrf.mxu0 }
 0x2b0   :  { %v436_v62 = vmax.f32 %v432_v59, 0.0 }
 0x2b2   :  { %v437_v63 = vpack.c.bf16 %v436_v62, %v435_v61 }
 0x2b4   :  { %722 = vmatmul.mubr.bf16.vlgmr.msra.gmra.mxu1 %v437_v63 }
 0x374   :  { %v543_v1 = vpop.f32.mrf.mxu1 }
 0x375   :  { %v544_v2 = vadd.f32 %v600_v0, %v543_v1 }
 0x376   :  { %v723_v3 = vpop.f32.mrf.mxu1 }
 0x377   :  { %550 = vst [vmem:[#allocation10] sm:$0xff] %v544_v2 }
 0x378   :  { %v546_v4 = vpop.f32.mrf.mxu1 }
 0x379   :  { %v547_v5 = vadd.f32 %v600_v0, %v546_v4 }
 0x37a   :  { %v724_v6 = vpop.f32.mrf.mxu1 }
 0x37b   :  { %551 = vst [vmem:[#allocation10 + $0x8] sm:$0xff] %v547_v5 }
 0x37c   :  { %860 = shalt.err (!%p857_p10)
}
 0x37d   :  { %s886_s28 = smov 128   ;;  %s887_s6 = smov 8  }
 0x37e   :  { %563 = dma.vmem_to_hbm [thread:$0]  %s558_s27, 256, %s1014_s7, [#allocation4], %s886_s28, %s886_s28, %s887_s6  }
 0x37f   :  { %875 = dma.done.wait [#allocation4], 256  }
 0x380   :  { %876 = vsyncadd [#allocation4], 4294967040 }
 0x381   :  { %567 = vsyncpa [#allocation3], 1 }
 0x382   :  { %568 = vsyncpa [#allocation6], 1 }
 0x383   :  { %569 = vsyncpa [#allocation9], 1 }
 0x384   :  { %570 = vsyncpa [#allocation4], 1 }

</bundles_post_ra>
